<compile_context>
chip_gen: v7x
topology: tpu7x:2x2x1
jax: 0.10.0
libtpu: 0.0.40
codegen_flags: <defaults>
</compile_context>

<pallas_src>
import jax
import jax.numpy as jnp
from jax.experimental import pallas as pl
from jax.experimental.pallas import tpu as pltpu


# --------------------------------------------------------------------------- #
# Kernels
# --------------------------------------------------------------------------- #
def _vmem_gather_kernel(idx_ref, emb_ref, out_ref):
    """Small-vocab fast path.

    idx_ref : (N_pad,) int32 in SMEM (scalar prefetch)
    emb_ref : (V_pad, H_pad) full embedding table, VMEM-resident (constant index_map)
    out_ref : (TILE_N, H_pad) dense output block
    """
    tile_n = out_ref.shape[0]
    base = pl.program_id(0) * tile_n

    @pl.loop(0, tile_n, unroll=tile_n <= 32)
    def _(t):
        row = idx_ref[base + t]
        out_ref[pl.ds(t, 1), :] = emb_ref[pl.ds(row, 1), :]


def _hbm_gather_kernel(idx_ref, emb_hbm_ref, out_ref, copy_sems):
    """Large-vocab path: per-row HBM DMAs straight into the dense output block.

    idx_ref     : (N_pad,) int32 in SMEM (scalar prefetch)
    emb_hbm_ref : (V_pad, H_pad) embedding table left in HBM (memory_space=pl.ANY)
    out_ref     : (TILE_N, H_pad) dense output block (DMA destination)
    copy_sems   : (TILE_N,) DMA semaphores
    """
    tile_n = out_ref.shape[0]
    base = pl.program_id(0) * tile_n

    # Issue all TILE_N row DMAs (kept in flight simultaneously)...
    @pl.loop(0, tile_n)
    def _(t):
        row = idx_ref[base + t]
        pltpu.make_async_copy(
            emb_hbm_ref.at[pl.ds(row, 1), :],
            out_ref.at[pl.ds(t, 1), :],
            copy_sems.at[t],
        ).start()

    # ...then drain them.  Shapes match the start descriptors, so byte counts agree.
    @pl.loop(0, tile_n)
    def _(t):
        pltpu.make_async_copy(
            emb_hbm_ref.at[pl.ds(0, 1), :],
            out_ref.at[pl.ds(t, 1), :],
            copy_sems.at[t],
        ).wait()


# --------------------------------------------------------------------------- #
# Wrapper
# --------------------------------------------------------------------------- #
def _round_up(x, m):
    return ((x + m - 1) // m) * m


def _vmem_capacity_bytes():
    try:
        return int(pltpu.get_tpu_info().vmem_capacity_bytes)
    except Exception:
        return 64 * 1024 * 1024  # conservative (v7x-sized) fallback


def no_encoder_forward(batch, embed_matrix, doc_len=None, *, force_path=None,
                       tile_n=None):
    """Pallas equivalent of NoEncoder.forward(batch, doc_len) -> embed(batch)."""
    del doc_len  # unused, matching the PyTorch module
    orig_shape = batch.shape
    V, H = embed_matrix.shape
    N = int(batch.size)
    dtype = embed_matrix.dtype
    itemsize = jnp.dtype(dtype).itemsize

    # Lane-dense layout: pad H to a multiple of 128 lanes, V to a multiple of 8 sublanes.
    H_pad = _round_up(H, 128)
    V_pad = _round_up(max(V, 1), 8)

    # Token tile: multiple of 8 sublanes, ~256 tokens per step at production sizes.
    if tile_n is None:
        tile_n = min(256, _round_up(N, 8))
    tile_n = max(8, _round_up(tile_n, 8))
    N_pad = _round_up(N, tile_n)
    grid = (N_pad // tile_n,)

    # Flat int32 ids, clamped so every DMA / VMEM row read stays in bounds.
    idx = jnp.clip(batch.reshape(N).astype(jnp.int32), 0, V - 1)
    if N_pad != N:
        idx = jnp.concatenate([idx, jnp.zeros((N_pad - N,), jnp.int32)])

    emb = embed_matrix
    if (V_pad, H_pad) != (V, H):
        emb = jnp.zeros((V_pad, H_pad), dtype).at[:V, :H].set(embed_matrix)

    # Generation-aware dispatch: VMEM-resident table only if it comfortably fits
    # (~24 MiB on v7x's 64 MiB VMEM, ~48 MiB on v5e/v6e's 128 MiB).
    table_bytes = V_pad * H_pad * itemsize
    vmem_cap = _vmem_capacity_bytes()
    resident_budget = (3 * vmem_cap) // 8
    use_vmem_path = table_bytes <= resident_budget
    if force_path == "vmem":
        use_vmem_path = True
    elif force_path == "hbm":
        use_vmem_path = False

    out_block_bytes = tile_n * H_pad * itemsize
    out_shape = jax.ShapeDtypeStruct((N_pad, H_pad), dtype)

    if use_vmem_path:
        # Raise the scoped-VMEM limit enough for (possibly double-buffered) table +
        # double-buffered output blocks, but never past ~90% of physical VMEM.
        vmem_limit = max(2 * table_bytes + 4 * out_block_bytes + (4 << 20), 32 << 20)
        vmem_limit = int(min(vmem_limit, (vmem_cap * 9) // 10))

        grid_spec = pltpu.PrefetchScalarGridSpec(
            num_scalar_prefetch=1,              # idx -> SMEM, seen by every index_map
            grid=grid,
            in_specs=[
                # Full-extent block, constant index_map -> DMA'd once, stays resident.
                pl.BlockSpec((V_pad, H_pad), lambda i, ids: (0, 0)),
            ],
            out_specs=pl.BlockSpec((tile_n, H_pad), lambda i, ids: (i, 0)),
        )
        out_flat = pl.pallas_call(
            _vmem_gather_kernel,
            out_shape=out_shape,
            grid_spec=grid_spec,
            compiler_params=pltpu.CompilerParams(
                dimension_semantics=("parallel",),
                vmem_limit_bytes=vmem_limit,
            ),
        )(idx, emb)
    else:
        grid_spec = pltpu.PrefetchScalarGridSpec(
            num_scalar_prefetch=1,
            grid=grid,
            in_specs=[pl.BlockSpec(memory_space=pl.ANY)],   # table stays in HBM
            out_specs=pl.BlockSpec((tile_n, H_pad), lambda i, ids: (i, 0)),
            scratch_shapes=[pltpu.SemaphoreType.DMA((tile_n,))],
        )
        out_flat = pl.pallas_call(
            _hbm_gather_kernel,
            out_shape=out_shape,
            grid_spec=grid_spec,
            compiler_params=pltpu.CompilerParams(
                dimension_semantics=("parallel",),
            ),
        )(idx, emb)

    return out_flat[:N, :H].reshape(orig_shape + (H,))


# --------------------------------------------------------------------------- #
# Self-test
# --------------------------------------------------------------------------- #
if __name__ == "__main__":
    key = jax.random.PRNGKey(0)
    k_emb, k_idx, k_emb2, k_idx2 = jax.random.split(key, 4)

    # --- Case 1: small vocab -> VMEM-resident-table fast path ---------------
    name2id = {f"entity_{i}": i for i in range(16)}   # synthetic vocabulary
    V = len(name2id)
    H = 32           # hidden_size (small for the test; module default is 100)
    B, S = 2, 8

    # nn.Embedding default-initializes weights ~ N(0, 1); do the same.
    embed_matrix = jax.random.normal(k_emb, (V, H), dtype=jnp.float32)
    batch = jax.random.randint(k_idx, (B, S), 0, V, dtype=jnp.int32)

    out = jax.block_until_ready(no_encoder_forward(batch, embed_matrix, None))
    ref = embed_matrix[batch]
    assert out.shape == (B, S, H), out.shape
    assert jnp.array_equal(out, ref)

    # --- Case 2: force the large-vocab HBM row-DMA gather path --------------
    V2, H2 = 512, 48
    embed_matrix2 = jax.random.normal(k_emb2, (V2, H2), dtype=jnp.float32)
    batch2 = jax.random.randint(k_idx2, (B, S), 0, V2, dtype=jnp.int32)

    out2 = jax.block_until_ready(
        no_encoder_forward(batch2, embed_matrix2, None, force_path="hbm"))
    ref2 = embed_matrix2[batch2]
    assert out2.shape == (B, S, H2), out2.shape
    assert jnp.array_equal(out2, ref2)

    print("KERNEL_OK")
</pallas_src>

<mosaic_0001>
module attributes {stable_mosaic.version = 11 : i64} {
  func.func @_vmem_gather_kernel(%arg0: i32, %arg1: memref<16xi32, #tpu.memory_space<smem>>, %arg2: memref<16x128xf32, #tpu.memory_space<vmem>>, %arg3: memref<16x128xf32, #tpu.memory_space<vmem>>) attributes {dimension_semantics = [#tpu.dimension_semantics<parallel>], iteration_bounds = array<i64: 1>, scalar_prefetch = 1 : i64, scratch_operands = 0 : i64, tpu.core_type = #tpu.core_type<tc>, window_params = [{pipeline_mode = #tpu.pipeline_mode<synchronous>, transform_indices = @transform_0, window_bounds = array<i64: 16, 128>}, {transform_indices = @transform_1, window_bounds = array<i64: 16, 128>}]} {
    %c16_i32 = arith.constant 16 : i32
    %0 = arith.muli %arg0, %c16_i32 : i32
    %c0_i32 = arith.constant 0 : i32
    %c1_i32 = arith.constant 1 : i32
    %1 = arith.muli %c0_i32, %c1_i32 : i32
    %c0_i32_0 = arith.constant 0 : i32
    %2 = arith.addi %c0_i32_0, %1 : i32
    %3 = arith.addi %0, %2 : i32
    %4 = arith.index_cast %3 : i32 to index
    %5 = memref.load %arg1[%4] : memref<16xi32, #tpu.memory_space<smem>>
    %6 = arith.index_cast %5 : i32 to index
    %c0 = arith.constant 0 : index
    %7 = vector.load %arg2[%6, %c0] : memref<16x128xf32, #tpu.memory_space<vmem>>, vector<1x128xf32>
    %8 = arith.index_cast %2 : i32 to index
    %c0_1 = arith.constant 0 : index
    %9 = vector.load %arg3[%8, %c0_1] : memref<16x128xf32, #tpu.memory_space<vmem>>, vector<1x128xf32>
    tpu.vector_store %arg3[%8, %c0_1], %7 {strides = array<i32>} : memref<16x128xf32, #tpu.memory_space<vmem>>, vector<1x128xf32>,
    %c1_i32_2 = arith.constant 1 : i32
    %c1_i32_3 = arith.constant 1 : i32
    %10 = arith.muli %c1_i32_2, %c1_i32_3 : i32
    %c0_i32_4 = arith.constant 0 : i32
    %11 = arith.addi %c0_i32_4, %10 : i32
    %12 = arith.addi %0, %11 : i32
    %13 = arith.index_cast %12 : i32 to index
    %14 = memref.load %arg1[%13] : memref<16xi32, #tpu.memory_space<smem>>
    %15 = arith.index_cast %14 : i32 to index
    %c0_5 = arith.constant 0 : index
    %16 = vector.load %arg2[%15, %c0_5] : memref<16x128xf32, #tpu.memory_space<vmem>>, vector<1x128xf32>
    %17 = arith.index_cast %11 : i32 to index
    %c0_6 = arith.constant 0 : index
    %18 = vector.load %arg3[%17, %c0_6] : memref<16x128xf32, #tpu.memory_space<vmem>>, vector<1x128xf32>
    tpu.vector_store %arg3[%17, %c0_6], %16 {strides = array<i32>} : memref<16x128xf32, #tpu.memory_space<vmem>>, vector<1x128xf32>,
    %c2_i32 = arith.constant 2 : i32
    %c1_i32_7 = arith.constant 1 : i32
    %19 = arith.muli %c2_i32, %c1_i32_7 : i32
    %c0_i32_8 = arith.constant 0 : i32
    %20 = arith.addi %c0_i32_8, %19 : i32
    %21 = arith.addi %0, %20 : i32
    %22 = arith.index_cast %21 : i32 to index
    %23 = memref.load %arg1[%22] : memref<16xi32, #tpu.memory_space<smem>>
    %24 = arith.index_cast %23 : i32 to index
    %c0_9 = arith.constant 0 : index
    %25 = vector.load %arg2[%24, %c0_9] : memref<16x128xf32, #tpu.memory_space<vmem>>, vector<1x128xf32>
    %26 = arith.index_cast %20 : i32 to index
    %c0_10 = arith.constant 0 : index
    %27 = vector.load %arg3[%26, %c0_10] : memref<16x128xf32, #tpu.memory_space<vmem>>, vector<1x128xf32>
    tpu.vector_store %arg3[%26, %c0_10], %25 {strides = array<i32>} : memref<16x128xf32, #tpu.memory_space<vmem>>, vector<1x128xf32>,
    %c3_i32 = arith.constant 3 : i32
    %c1_i32_11 = arith.constant 1 : i32
    %28 = arith.muli %c3_i32, %c1_i32_11 : i32
    %c0_i32_12 = arith.constant 0 : i32
    %29 = arith.addi %c0_i32_12, %28 : i32
    %30 = arith.addi %0, %29 : i32
    %31 = arith.index_cast %30 : i32 to index
    %32 = memref.load %arg1[%31] : memref<16xi32, #tpu.memory_space<smem>>
    %33 = arith.index_cast %32 : i32 to index
    %c0_13 = arith.constant 0 : index
    %34 = vector.load %arg2[%33, %c0_13] : memref<16x128xf32, #tpu.memory_space<vmem>>, vector<1x128xf32>
    %35 = arith.index_cast %29 : i32 to index
    %c0_14 = arith.constant 0 : index
    %36 = vector.load %arg3[%35, %c0_14] : memref<16x128xf32, #tpu.memory_space<vmem>>, vector<1x128xf32>
    tpu.vector_store %arg3[%35, %c0_14], %34 {strides = array<i32>} : memref<16x128xf32, #tpu.memory_space<vmem>>, vector<1x128xf32>,
    %c4_i32 = arith.constant 4 : i32
    %c1_i32_15 = arith.constant 1 : i32
    %37 = arith.muli %c4_i32, %c1_i32_15 : i32
    %c0_i32_16 = arith.constant 0 : i32
    %38 = arith.addi %c0_i32_16, %37 : i32
    %39 = arith.addi %0, %38 : i32
    %40 = arith.index_cast %39 : i32 to index
    %41 = memref.load %arg1[%40] : memref<16xi32, #tpu.memory_space<smem>>
    %42 = arith.index_cast %41 : i32 to index
    %c0_17 = arith.constant 0 : index
    %43 = vector.load %arg2[%42, %c0_17] : memref<16x128xf32, #tpu.memory_space<vmem>>, vector<1x128xf32>
    %44 = arith.index_cast %38 : i32 to index
    %c0_18 = arith.constant 0 : index
    %45 = vector.load %arg3[%44, %c0_18] : memref<16x128xf32, #tpu.memory_space<vmem>>, vector<1x128xf32>
    tpu.vector_store %arg3[%44, %c0_18], %43 {strides = array<i32>} : memref<16x128xf32, #tpu.memory_space<vmem>>, vector<1x128xf32>,
    %c5_i32 = arith.constant 5 : i32
    %c1_i32_19 = arith.constant 1 : i32
    %46 = arith.muli %c5_i32, %c1_i32_19 : i32
    %c0_i32_20 = arith.constant 0 : i32
    %47 = arith.addi %c0_i32_20, %46 : i32
    %48 = arith.addi %0, %47 : i32
    %49 = arith.index_cast %48 : i32 to index
    %50 = memref.load %arg1[%49] : memref<16xi32, #tpu.memory_space<smem>>
    %51 = arith.index_cast %50 : i32 to index
    %c0_21 = arith.constant 0 : index
    %52 = vector.load %arg2[%51, %c0_21] : memref<16x128xf32, #tpu.memory_space<vmem>>, vector<1x128xf32>
    %53 = arith.index_cast %47 : i32 to index
    %c0_22 = arith.constant 0 : index
    %54 = vector.load %arg3[%53, %c0_22] : memref<16x128xf32, #tpu.memory_space<vmem>>, vector<1x128xf32>
    tpu.vector_store %arg3[%53, %c0_22], %52 {strides = array<i32>} : memref<16x128xf32, #tpu.memory_space<vmem>>, vector<1x128xf32>,
    %c6_i32 = arith.constant 6 : i32
    %c1_i32_23 = arith.constant 1 : i32
    %55 = arith.muli %c6_i32, %c1_i32_23 : i32
    %c0_i32_24 = arith.constant 0 : i32
    %56 = arith.addi %c0_i32_24, %55 : i32
    %57 = arith.addi %0, %56 : i32
    %58 = arith.index_cast %57 : i32 to index
    %59 = memref.load %arg1[%58] : memref<16xi32, #tpu.memory_space<smem>>
    %60 = arith.index_cast %59 : i32 to index
    %c0_25 = arith.constant 0 : index
    %61 = vector.load %arg2[%60, %c0_25] : memref<16x128xf32, #tpu.memory_space<vmem>>, vector<1x128xf32>
    %62 = arith.index_cast %56 : i32 to index
    %c0_26 = arith.constant 0 : index
    %63 = vector.load %arg3[%62, %c0_26] : memref<16x128xf32, #tpu.memory_space<vmem>>, vector<1x128xf32>
    tpu.vector_store %arg3[%62, %c0_26], %61 {strides = array<i32>} : memref<16x128xf32, #tpu.memory_space<vmem>>, vector<1x128xf32>,
    %c7_i32 = arith.constant 7 : i32
    %c1_i32_27 = arith.constant 1 : i32
    %64 = arith.muli %c7_i32, %c1_i32_27 : i32
    %c0_i32_28 = arith.constant 0 : i32
    %65 = arith.addi %c0_i32_28, %64 : i32
    %66 = arith.addi %0, %65 : i32
    %67 = arith.index_cast %66 : i32 to index
    %68 = memref.load %arg1[%67] : memref<16xi32, #tpu.memory_space<smem>>
    %69 = arith.index_cast %68 : i32 to index
    %c0_29 = arith.constant 0 : index
    %70 = vector.load %arg2[%69, %c0_29] : memref<16x128xf32, #tpu.memory_space<vmem>>, vector<1x128xf32>
    %71 = arith.index_cast %65 : i32 to index
    %c0_30 = arith.constant 0 : index
    %72 = vector.load %arg3[%71, %c0_30] : memref<16x128xf32, #tpu.memory_space<vmem>>, vector<1x128xf32>
    tpu.vector_store %arg3[%71, %c0_30], %70 {strides = array<i32>} : memref<16x128xf32, #tpu.memory_space<vmem>>, vector<1x128xf32>,
    %c8_i32 = arith.constant 8 : i32
    %c1_i32_31 = arith.constant 1 : i32
    %73 = arith.muli %c8_i32, %c1_i32_31 : i32
    %c0_i32_32 = arith.constant 0 : i32
    %74 = arith.addi %c0_i32_32, %73 : i32
    %75 = arith.addi %0, %74 : i32
    %76 = arith.index_cast %75 : i32 to index
    %77 = memref.load %arg1[%76] : memref<16xi32, #tpu.memory_space<smem>>
    %78 = arith.index_cast %77 : i32 to index
    %c0_33 = arith.constant 0 : index
    %79 = vector.load %arg2[%78, %c0_33] : memref<16x128xf32, #tpu.memory_space<vmem>>, vector<1x128xf32>
    %80 = arith.index_cast %74 : i32 to index
    %c0_34 = arith.constant 0 : index
    %81 = vector.load %arg3[%80, %c0_34] : memref<16x128xf32, #tpu.memory_space<vmem>>, vector<1x128xf32>
    tpu.vector_store %arg3[%80, %c0_34], %79 {strides = array<i32>} : memref<16x128xf32, #tpu.memory_space<vmem>>, vector<1x128xf32>,
    %c9_i32 = arith.constant 9 : i32
    %c1_i32_35 = arith.constant 1 : i32
    %82 = arith.muli %c9_i32, %c1_i32_35 : i32
    %c0_i32_36 = arith.constant 0 : i32
    %83 = arith.addi %c0_i32_36, %82 : i32
    %84 = arith.addi %0, %83 : i32
    %85 = arith.index_cast %84 : i32 to index
    %86 = memref.load %arg1[%85] : memref<16xi32, #tpu.memory_space<smem>>
    %87 = arith.index_cast %86 : i32 to index
    %c0_37 = arith.constant 0 : index
    %88 = vector.load %arg2[%87, %c0_37] : memref<16x128xf32, #tpu.memory_space<vmem>>, vector<1x128xf32>
    %89 = arith.index_cast %83 : i32 to index
    %c0_38 = arith.constant 0 : index
    %90 = vector.load %arg3[%89, %c0_38] : memref<16x128xf32, #tpu.memory_space<vmem>>, vector<1x128xf32>
    tpu.vector_store %arg3[%89, %c0_38], %88 {strides = array<i32>} : memref<16x128xf32, #tpu.memory_space<vmem>>, vector<1x128xf32>,
    %c10_i32 = arith.constant 10 : i32
    %c1_i32_39 = arith.constant 1 : i32
    %91 = arith.muli %c10_i32, %c1_i32_39 : i32
    %c0_i32_40 = arith.constant 0 : i32
    %92 = arith.addi %c0_i32_40, %91 : i32
    %93 = arith.addi %0, %92 : i32
    %94 = arith.index_cast %93 : i32 to index
    %95 = memref.load %arg1[%94] : memref<16xi32, #tpu.memory_space<smem>>
    %96 = arith.index_cast %95 : i32 to index
    %c0_41 = arith.constant 0 : index
    %97 = vector.load %arg2[%96, %c0_41] : memref<16x128xf32, #tpu.memory_space<vmem>>, vector<1x128xf32>
    %98 = arith.index_cast %92 : i32 to index
    %c0_42 = arith.constant 0 : index
    %99 = vector.load %arg3[%98, %c0_42] : memref<16x128xf32, #tpu.memory_space<vmem>>, vector<1x128xf32>
    tpu.vector_store %arg3[%98, %c0_42], %97 {strides = array<i32>} : memref<16x128xf32, #tpu.memory_space<vmem>>, vector<1x128xf32>,
    %c11_i32 = arith.constant 11 : i32
    %c1_i32_43 = arith.constant 1 : i32
    %100 = arith.muli %c11_i32, %c1_i32_43 : i32
    %c0_i32_44 = arith.constant 0 : i32
    %101 = arith.addi %c0_i32_44, %100 : i32
    %102 = arith.addi %0, %101 : i32
    %103 = arith.index_cast %102 : i32 to index
    %104 = memref.load %arg1[%103] : memref<16xi32, #tpu.memory_space<smem>>
    %105 = arith.index_cast %104 : i32 to index
    %c0_45 = arith.constant 0 : index
    %106 = vector.load %arg2[%105, %c0_45] : memref<16x128xf32, #tpu.memory_space<vmem>>, vector<1x128xf32>
    %107 = arith.index_cast %101 : i32 to index
    %c0_46 = arith.constant 0 : index
    %108 = vector.load %arg3[%107, %c0_46] : memref<16x128xf32, #tpu.memory_space<vmem>>, vector<1x128xf32>
    tpu.vector_store %arg3[%107, %c0_46], %106 {strides = array<i32>} : memref<16x128xf32, #tpu.memory_space<vmem>>, vector<1x128xf32>,
    %c12_i32 = arith.constant 12 : i32
    %c1_i32_47 = arith.constant 1 : i32
    %109 = arith.muli %c12_i32, %c1_i32_47 : i32
    %c0_i32_48 = arith.constant 0 : i32
    %110 = arith.addi %c0_i32_48, %109 : i32
    %111 = arith.addi %0, %110 : i32
    %112 = arith.index_cast %111 : i32 to index
    %113 = memref.load %arg1[%112] : memref<16xi32, #tpu.memory_space<smem>>
    %114 = arith.index_cast %113 : i32 to index
    %c0_49 = arith.constant 0 : index
    %115 = vector.load %arg2[%114, %c0_49] : memref<16x128xf32, #tpu.memory_space<vmem>>, vector<1x128xf32>
    %116 = arith.index_cast %110 : i32 to index
    %c0_50 = arith.constant 0 : index
    %117 = vector.load %arg3[%116, %c0_50] : memref<16x128xf32, #tpu.memory_space<vmem>>, vector<1x128xf32>
    tpu.vector_store %arg3[%116, %c0_50], %115 {strides = array<i32>} : memref<16x128xf32, #tpu.memory_space<vmem>>, vector<1x128xf32>,
    %c13_i32 = arith.constant 13 : i32
    %c1_i32_51 = arith.constant 1 : i32
    %118 = arith.muli %c13_i32, %c1_i32_51 : i32
    %c0_i32_52 = arith.constant 0 : i32
    %119 = arith.addi %c0_i32_52, %118 : i32
    %120 = arith.addi %0, %119 : i32
    %121 = arith.index_cast %120 : i32 to index
    %122 = memref.load %arg1[%121] : memref<16xi32, #tpu.memory_space<smem>>
    %123 = arith.index_cast %122 : i32 to index
    %c0_53 = arith.constant 0 : index
    %124 = vector.load %arg2[%123, %c0_53] : memref<16x128xf32, #tpu.memory_space<vmem>>, vector<1x128xf32>
    %125 = arith.index_cast %119 : i32 to index
    %c0_54 = arith.constant 0 : index
    %126 = vector.load %arg3[%125, %c0_54] : memref<16x128xf32, #tpu.memory_space<vmem>>, vector<1x128xf32>
    tpu.vector_store %arg3[%125, %c0_54], %124 {strides = array<i32>} : memref<16x128xf32, #tpu.memory_space<vmem>>, vector<1x128xf32>,
    %c14_i32 = arith.constant 14 : i32
    %c1_i32_55 = arith.constant 1 : i32
    %127 = arith.muli %c14_i32, %c1_i32_55 : i32
    %c0_i32_56 = arith.constant 0 : i32
    %128 = arith.addi %c0_i32_56, %127 : i32
    %129 = arith.addi %0, %128 : i32
    %130 = arith.index_cast %129 : i32 to index
    %131 = memref.load %arg1[%130] : memref<16xi32, #tpu.memory_space<smem>>
    %132 = arith.index_cast %131 : i32 to index
    %c0_57 = arith.constant 0 : index
    %133 = vector.load %arg2[%132, %c0_57] : memref<16x128xf32, #tpu.memory_space<vmem>>, vector<1x128xf32>
    %134 = arith.index_cast %128 : i32 to index
    %c0_58 = arith.constant 0 : index
    %135 = vector.load %arg3[%134, %c0_58] : memref<16x128xf32, #tpu.memory_space<vmem>>, vector<1x128xf32>
    tpu.vector_store %arg3[%134, %c0_58], %133 {strides = array<i32>} : memref<16x128xf32, #tpu.memory_space<vmem>>, vector<1x128xf32>,
    %c15_i32 = arith.constant 15 : i32
    %c1_i32_59 = arith.constant 1 : i32
    %136 = arith.muli %c15_i32, %c1_i32_59 : i32
    %c0_i32_60 = arith.constant 0 : i32
    %137 = arith.addi %c0_i32_60, %136 : i32
    %138 = arith.addi %0, %137 : i32
    %139 = arith.index_cast %138 : i32 to index
    %140 = memref.load %arg1[%139] : memref<16xi32, #tpu.memory_space<smem>>
    %141 = arith.index_cast %140 : i32 to index
    %c0_61 = arith.constant 0 : index
    %142 = vector.load %arg2[%141, %c0_61] : memref<16x128xf32, #tpu.memory_space<vmem>>, vector<1x128xf32>
    %143 = arith.index_cast %137 : i32 to index
    %c0_62 = arith.constant 0 : index
    %144 = vector.load %arg3[%143, %c0_62] : memref<16x128xf32, #tpu.memory_space<vmem>>, vector<1x128xf32>
    tpu.vector_store %arg3[%143, %c0_62], %142 {strides = array<i32>} : memref<16x128xf32, #tpu.memory_space<vmem>>, vector<1x128xf32>,
    %c16_i32_63 = arith.constant 16 : i32
    return
  }
  func.func @transform_0(%arg0: i32, %arg1: memref<16xi32, #tpu.memory_space<smem>>) -> (i32, i32) {
    %c0_i32 = arith.constant 0 : i32
    %c0_i32_0 = arith.constant 0 : i32
    %c0_i32_1 = arith.constant 0 : i32
    return %c0_i32, %c0_i32_0 : i32, i32
  }
  func.func @transform_1(%arg0: i32, %arg1: memref<16xi32, #tpu.memory_space<smem>>) -> (i32, i32) {
    %c0_i32 = arith.constant 0 : i32
    %c0_i32_0 = arith.constant 0 : i32
    return %arg0, %c0_i32 : i32, i32
  }
}

</mosaic_0001>

<bundles_post_ra>
// kernel: tpu_custom_call.1
= control target key start
LH: loop header
LB: loop body
LE: loop exit
PB: predicated region body
PF: predicated region fallthrough
CT: control target
= control target key end

     0   :  { %s295_s0 = inlined_call_operand.hbm [shape: s32[16], index: 0, kind: input, shape index: {}]   ;;  %s296_s1 = inlined_call_operand.hbm [shape: f32[16,128], index: 1, kind: input, shape index: {}]   ;;  %s297_s2 = inlined_call_operand.hbm [shape: f32[16,128], index: 2, kind: output, shape index: {}]  }
   0x1   :  { %s161_s11 = scalar_lea.hbm %s295_s0, 16 }
   0x2   :  { %p162_p0 = scmp.ne.s32.totalorder %s295_s0, %s161_s11  ;;  %p165_p1 = scmp.lt.u32.totalorder %s161_s11, %s295_s0 }
   0x4   :  { %p167_p2 = pnand %p165_p1, %p162_p0 }
   0x6   :  { %170 = shalt.err (!%p167_p2)  }
   0x7   :  { %s221_s16 = smov [#allocation3]  }
   0x8   :  { %8 = dma.hbm_to_smem %s295_s0, 16, %s221_s16, [#allocation2] }
   0x9   :  { %215 = dma.done.wait [#allocation2], 16 }
   0xa   :  { %216 = vsyncadd [#allocation2], 4294967280 }
   0xb   :  { %10 = sfence }
   0xc   :  { %11 = vsyncpa [#allocation5], 0 }
   0xd   :  { %12 = vsyncpa [#allocation6], 0  ;;  %s222_s19 = smov [#allocation4]   ;;  %s171_s23 = scalar_lea.hbm %s296_s1, 256 }
   0xe   :  { %s18_s20 = sshll.u32 %s222_s19, 4  ;;  %p172_p3 = scmp.ne.s32.totalorder %s296_s1, %s171_s23  ;;  %s19_s20 = int_to_ptr.vmem [resolvable:$true] %s18_s20 }
   0xf   :  { %p175_p4 = scmp.lt.u32.totalorder %s171_s23, %s296_s1 }
  0x11   :  { %p177_p5 = pnand %p175_p4, %p172_p3 }
  0x13   :  { %180 = shalt.err (!%p177_p5)
}
  0x14   :  { %s181_s0 = scalar_lea.vmem %s19_s20, 256  ;;  %p186_p7 = scmp.lt.s32.totalorder %s19_s20, %s19_s20 }
  0x15   :  { %p182_p6 = scmp.ne.s32.totalorder %s19_s20, %s181_s0  ;;  %p187_p8 = scmp.lt.s32.totalorder %s181_s0, %s181_s0 }
  0x17   :  { %p188_p9 = por %p187_p8, %p186_p7 }
  0x19   :  { %p189_p10 = pnand %p188_p9, %p182_p6 }
  0x1b   :  { %192 = shalt.err (!%p189_p10)
}
  0x1c   :  { %s223_s28 = smov 128   ;;  %s224_s29 = smov 8  }
  0x1d   :  { %24 = dma.hbm_to_vmem [thread:$0]  %s296_s1, 256, %s19_s20, [#allocation5], %s223_s28, %s223_s28, %s224_s29  }
  0x1e   :  { %217 = dma.done.wait [#allocation5], 256  }
  0x1f   :  { %218 = vsyncadd [#allocation5], 4294967040  ;;  %s29_s4 = sld [smem:[#allocation3]]  ;;  %s141_s5 = sld [smem:[#allocation3 + $0x1]] }
  0x20   :  { %s142_s6 = sld [smem:[#allocation3 + $0x2]]  ;;  %s143_s7 = sld [smem:[#allocation3 + $0x3]] }
  0x21   :  { %s144_s8 = sld [smem:[#allocation3 + $0x4]]  ;;  %s145_s9 = sld [smem:[#allocation3 + $0x5]] }
  0x22   :  { %s146_s10 = sld [smem:[#allocation3 + $0x6]]  ;;  %s147_s11 = sld [smem:[#allocation3 + $0x7]] }
  0x23   :  { %s268_s12 = sld [smem:[#allocation3 + $0x8]]  ;;  %s270_s13 = sld [smem:[#allocation3 + $0x9]] }
  0x24   :  { %s272_s14 = sld [smem:[#allocation3 + $0xa]]  ;;  %s274_s15 = sld [smem:[#allocation3 + $0xb]] }
  0x25   :  { %s30_s16 = scalar_lea.vmem [#allocation4], %s29_s4  ;;  %s35_s1 = scalar_lea.vmem [#allocation4], %s141_s5 }
  0x26   :  { %v31_v0 = vld [vmem:[%s30_s16] sm:$0x1]  ;;  %s40_s17 = scalar_lea.vmem [#allocation4], %s142_s6  ;;  %s45_s18 = scalar_lea.vmem [#allocation4], %s143_s7 }
  0x27   :  { %v36_v1 = vld [vmem:[%s35_s1] sm:$0x1]  ;;  %32 = vst [vmem:[#allocation7] sm:$0x1] %v31_v0  ;;  %s50_s19 = scalar_lea.vmem [#allocation4], %s144_s8  ;;  %s55_s20 = scalar_lea.vmem [#allocation4], %s145_s9 }
  0x28   :  { %37 = vst [vmem:[#allocation7 + $0x1] sm:$0x1] %v36_v1  ;;  %v41_v2 = vld [vmem:[%s40_s17] sm:$0x1]  ;;  %s60_s21 = scalar_lea.vmem [#allocation4], %s146_s10  ;;  %s65_s22 = scalar_lea.vmem [#allocation4], %s147_s11 }
  0x29   :  { %v46_v3 = vld [vmem:[%s45_s18] sm:$0x1]  ;;  %42 = vst [vmem:[#allocation7 + $0x2] sm:$0x1] %v41_v2  ;;  %s70_s23 = scalar_lea.vmem [#allocation4], %s268_s12  ;;  %s75_s24 = scalar_lea.vmem [#allocation4], %s270_s13 }
  0x2a   :  { %47 = vst [vmem:[#allocation7 + $0x3] sm:$0x1] %v46_v3  ;;  %v51_v4 = vld [vmem:[%s50_s19] sm:$0x1]  ;;  %s80_s25 = scalar_lea.vmem [#allocation4], %s272_s14  ;;  %s85_s26 = scalar_lea.vmem [#allocation4], %s274_s15 }
  0x2b   :  { %v56_v5 = vld [vmem:[%s55_s20] sm:$0x1]  ;;  %52 = vst [vmem:[#allocation7 + $0x4] sm:$0x1] %v51_v4  ;;  %s152_s27 = sld [smem:[#allocation3 + $0xc]]  ;;  %s153_s0 = sld [smem:[#allocation3 + $0xd]] }
  0x2c   :  { %57 = vst [vmem:[#allocation7 + $0x5] sm:$0x1] %v56_v5  ;;  %v61_v6 = vld [vmem:[%s60_s21] sm:$0x1]  ;;  %s154_s30 = sld [smem:[#allocation3 + $0xe]]  ;;  %s155_s3 = sld [smem:[#allocation3 + $0xf]] }
  0x2d   :  { %v66_v7 = vld [vmem:[%s65_s22] sm:$0x1]  ;;  %62 = vst [vmem:[#allocation7 + $0x6] sm:$0x1] %v61_v6  ;;  %s225_s4 = smov [#allocation7]  }
  0x2e   :  { %67 = vst [vmem:[#allocation7 + $0x7] sm:$0x1] %v66_v7  ;;  %v71_v8 = vld [vmem:[%s70_s23] sm:$0x1]  ;;  %s113_s5 = sshll.u32 %s225_s4, 4  ;;  %s114_s5 = int_to_ptr.vmem [resolvable:$true] %s113_s5 }
  0x2f   :  { %v76_v9 = vld [vmem:[%s75_s24] sm:$0x1]  ;;  %72 = vst [vmem:[#allocation7 + $0x8] sm:$0x1] %v71_v8  ;;  %s193_s10 = scalar_lea.vmem %s114_s5, 256  ;;  %p198_p12 = scmp.lt.s32.totalorder %s114_s5, %s114_s5 }
  0x30   :  { %77 = vst [vmem:[#allocation7 + $0x9] sm:$0x1] %v76_v9  ;;  %v81_v10 = vld [vmem:[%s80_s25] sm:$0x1]  ;;  %p194_p11 = scmp.ne.s32.totalorder %s114_s5, %s193_s10  ;;  %p199_p13 = scmp.lt.s32.totalorder %s193_s10, %s193_s10 }
  0x31   :  { %v86_v11 = vld [vmem:[%s85_s26] sm:$0x1]  ;;  %82 = vst [vmem:[#allocation7 + $0xa] sm:$0x1] %v81_v10  ;;  %s90_s6 = scalar_lea.vmem [#allocation4], %s152_s27  ;;  %s95_s7 = scalar_lea.vmem [#allocation4], %s153_s0 }
  0x32   :  { %87 = vst [vmem:[#allocation7 + $0xb] sm:$0x1] %v86_v11  ;;  %v91_v12 = vld [vmem:[%s90_s6] sm:$0x1]  ;;  %s100_s8 = scalar_lea.vmem [#allocation4], %s154_s30  ;;  %s105_s9 = scalar_lea.vmem [#allocation4], %s155_s3 }
  0x33   :  { %92 = vst [vmem:[#allocation7 + $0xc] sm:$0x1] %v91_v12  ;;  %v96_v13 = vld [vmem:[%s95_s7] sm:$0x1]  ;;  %p200_p0 = por %p199_p13, %p198_p12 }
  0x34   :  { %v101_v14 = vld [vmem:[%s100_s8] sm:$0x1]  ;;  %97 = vst [vmem:[#allocation7 + $0xd] sm:$0x1] %v96_v13 }
  0x35   :  { %102 = vst [vmem:[#allocation7 + $0xe] sm:$0x1] %v101_v14  ;;  %v106_v15 = vld [vmem:[%s105_s9] sm:$0x1]  ;;  %p201_p1 = pnand %p200_p0, %p194_p11 }
  0x36   :  { %107 = vst [vmem:[#allocation7 + $0xf] sm:$0x1] %v106_v15 }
  0x37   :  { %204 = shalt.err (!%p201_p1)
}
  0x38   :  { %s205_s13 = scalar_lea.hbm %s297_s2, 256 }
  0x39   :  { %p206_p2 = scmp.ne.s32.totalorder %s297_s2, %s205_s13  ;;  %p209_p3 = scmp.lt.u32.totalorder %s205_s13, %s297_s2 }
  0x3b   :  { %p211_p4 = pnand %p209_p3, %p206_p2 }
  0x3d   :  { %214 = shalt.err (!%p211_p4)
}
  0x3e   :  { %119 = dma.vmem_to_hbm [thread:$0]  %s114_s5, 256, %s297_s2, [#allocation6], %s223_s28, %s223_s28, %s224_s29  }
  0x3f   :  { %219 = dma.done.wait [#allocation6], 256  }
  0x40   :  { %220 = vsyncadd [#allocation6], 4294967040 }
  0x41   :  { %123 = vsyncpa [#allocation5], 1 }
  0x42   :  { %124 = vsyncpa [#allocation6], 1 }

</bundles_post_ra>
